<compile_context>
chip_gen: v6e
topology: v6e:2x2x1
jax: 0.10.0
libtpu: 0.0.40
codegen_flags: <defaults>
</compile_context>

<pallas_src>
import functools

import jax
import jax.numpy as jnp
from jax.experimental import pallas as pl
from jax.experimental.pallas import tpu as pltpu


def _det_loss_kernel(row_ids_ref, dists_ref, anc_ref, pos_ref, out_ref,
                     fp_acc, cn_acc, *, n, tn, ncol):
    """One (tm, tn) tile of the distance matrix.

    Grid = (row_tiles, col_tiles); the col axis ("arbitrary", trailing) keeps
    running max/min accumulators in VMEM scratch and finalizes on its last step.
    """
    j = pl.program_id(1)
    tm = dists_ref.shape[0]

    # Native-dtype DMA; cast to f32 after the load (halves HBM traffic for bf16).
    d = dists_ref[...].astype(jnp.float32)                         # (tm, tn)

    # Diagonal test: a single full-tile lane iota compared against the global
    # row ids (shifted by the column-tile offset on the cheap (tm, 1) axis).
    col = jax.lax.broadcasted_iota(jnp.int32, (tm, tn), 1)
    rid = row_ids_ref[...]                                          # (tm, 1) int32
    if ncol > 1:
        rid = rid - j * tn
    on_diag = col == rid                                            # (tm, tn) bool

    # furthest_positive partial: max over tile of (dists * eye)  == where(diag, d, 0)
    fp_part = jnp.max(jnp.where(on_diag, d, 0.0), axis=1, keepdims=True)

    # closest_negative partial: min over tile of (dists + 1e5 * eye)
    dd = d + jnp.where(on_diag, 100000.0, 0.0)
    if n % tn != 0:
        # Last column tile is ragged: padded columns must not win the min.
        dd = jnp.where(col < (n - j * tn), dd, jnp.inf)
    cn_part = jnp.min(dd, axis=1, keepdims=True)

    if ncol == 1:
        # Single column tile: no accumulator round-trip needed.
        score = anc_ref[...] + pos_ref[...]                         # f32 (tm, 1)
        out_ref[...] = (fp_part - cn_part) * score
    else:
        @pl.when(j == 0)
        def _init():
            fp_acc[...] = jnp.zeros_like(fp_acc)       # reference max includes 0s
            cn_acc[...] = jnp.full_like(cn_acc, jnp.inf)

        fp_acc[...] = jnp.maximum(fp_acc[...], fp_part)
        cn_acc[...] = jnp.minimum(cn_acc[...], cn_part)

        @pl.when(j == ncol - 1)
        def _finalize():
            score = anc_ref[...] + pos_ref[...]                     # f32 (tm, 1)
            out_ref[...] = (fp_acc[...] - cn_acc[...]) * score


def _sublane(itemsize):
    # Sublane packing: 8 rows per vreg group for 4-byte, 16 for 2-byte, 32 for 1-byte.
    return {1: 32, 2: 16}.get(itemsize, 8)


def _round_up(x, m):
    return ((x + m - 1) // m) * m


def _pick_tiles(n, itemsize):
    """Row/column tile sizes bounded by an explicit VMEM budget."""
    sub = _sublane(itemsize)
    try:
        phys = int(pltpu.get_tpu_info().vmem_capacity_bytes)
    except Exception:
        phys = 64 << 20                         # conservative (v7x-sized) fallback
    vmem_limit = int(min(phys // 2, 64 << 20))  # 64 MiB on v5e/v6e, 32 MiB on v7x
    # Per native dists tile budget: 2x double-buffered DMA + ~4-5 f32/i32
    # full-tile intermediates (cast / iota / select / penalized copy) must fit.
    budget = max(vmem_limit // 12, 256 << 10)

    # Row tile: whole problem, but split >=2 ways (when big enough) so the
    # "parallel" grid axis can shard across both TensorCores on v7x.
    if n <= sub:
        tm = n                                   # full dim -> legal block
    else:
        tm = _round_up(n, sub)
        if tm >= 2 * sub:
            tm = min(tm, _round_up((n + 1) // 2, sub))
        tm = min(tm, 512)

    # Column tile: full rows when they fit the budget, otherwise 128-lane multiples.
    if n <= 128 or tm * n * itemsize <= budget:
        tn = n
    else:
        tn = max(128, (budget // (tm * itemsize)) // 128 * 128)
        while tm > sub and tm * tn * itemsize > budget:
            tm = max(sub, _round_up(tm // 2, sub))
    return tm, tn, vmem_limit


def _legal_rows(tm, n, sub):
    if tm >= n:
        return n
    tm = (tm // sub) * sub
    return max(tm, min(sub, n))


def _legal_cols(tn, n):
    if tn >= n or n <= 128:
        return n
    return max(128, (tn // 128) * 128)


def det_loss(dists, anc_score, pos_score, *, tm=None, tn=None):
    n = dists.shape[0]
    assert dists.shape == (n, n)

    # Scores are tiny; cast to f32 in the wrapper so block shapes never depend
    # on their dtype.  Accept (N,) or (N,1).
    anc = jnp.asarray(anc_score, jnp.float32).reshape(n, 1)
    pos = jnp.asarray(pos_score, jnp.float32).reshape(n, 1)
    row_ids = jnp.arange(n, dtype=jnp.int32).reshape(n, 1)

    itemsize = jnp.dtype(dists.dtype).itemsize
    sub = _sublane(itemsize)
    auto_tm, auto_tn, vmem_limit = _pick_tiles(n, itemsize)
    tm = auto_tm if tm is None else _legal_rows(int(tm), n, sub)
    tn = auto_tn if tn is None else _legal_cols(int(tn), n)

    nrow = pl.cdiv(n, tm)
    ncol = pl.cdiv(n, tn)

    kernel = functools.partial(_det_loss_kernel, n=n, tn=tn, ncol=ncol)

    per_row = pl.pallas_call(
        kernel,
        out_shape=jax.ShapeDtypeStruct((n, 1), jnp.float32),
        grid=(nrow, ncol),
        in_specs=[
            pl.BlockSpec((tm, 1), lambda i, j: (i, 0)),    # global row ids (int32)
            pl.BlockSpec((tm, tn), lambda i, j: (i, j)),   # dists tile (native dtype)
            pl.BlockSpec((tm, 1), lambda i, j: (i, 0)),    # anc_score rows (f32)
            pl.BlockSpec((tm, 1), lambda i, j: (i, 0)),    # pos_score rows (f32)
        ],
        out_specs=pl.BlockSpec((tm, 1), lambda i, j: (i, 0)),
        scratch_shapes=[pltpu.VMEM((tm, 1), jnp.float32),   # furthest_positive acc
                        pltpu.VMEM((tm, 1), jnp.float32)],  # closest_negative acc
        compiler_params=pltpu.CompilerParams(
            dimension_semantics=("parallel", "arbitrary"),
            vmem_limit_bytes=vmem_limit),
    )(row_ids, dists, anc, pos)

    # Tiny finalize in the wrapper: mean over the per-row losses.
    return jnp.mean(per_row)


def det_loss_ref(dists, anc_score, pos_score):
    # Pure-JAX reference mirroring the PyTorch forward exactly.
    dists = dists.astype(jnp.float32)
    n = dists.shape[0]
    pids = jnp.arange(n)
    pos_mask = (pids[:, None] == pids[None, :]).astype(jnp.float32)
    furthest_positive = jnp.max(dists * pos_mask, axis=1)
    closest_negative = jnp.min(dists + 100000.0 * pos_mask, axis=1)
    anc = jnp.asarray(anc_score, jnp.float32).reshape(n)
    pos = jnp.asarray(pos_score, jnp.float32).reshape(n)
    loss = (furthest_positive - closest_negative) * (anc + pos)
    return jnp.mean(loss)


if __name__ == "__main__":
    # Test 1: small f32 problem (single row tile, single column tile).
    k1, k2, k3 = jax.random.split(jax.random.PRNGKey(0), 3)
    N = 8
    dists = jax.random.uniform(k1, (N, N), dtype=jnp.float32) * 2.0
    anc_score = jax.random.uniform(k2, (N, 1), dtype=jnp.float32)
    pos_score = jax.random.uniform(k3, (N, 1), dtype=jnp.float32)

    out = det_loss(dists, anc_score, pos_score)
    jax.block_until_ready(out)
    ref = det_loss_ref(dists, anc_score, pos_score)
    assert jnp.allclose(out, ref, atol=1e-5, rtol=1e-5), (out, ref)

    # Test 2: bf16 dists (native-dtype DMA), auto tiling -> two 16-row tiles
    # (bf16 sublane multiple), "parallel" row axis.
    k4, k5, k6 = jax.random.split(jax.random.PRNGKey(1), 3)
    N2 = 32
    dists2 = (jax.random.uniform(k4, (N2, N2), dtype=jnp.float32) * 2.0).astype(jnp.bfloat16)
    anc2 = jax.random.uniform(k5, (N2, 1), dtype=jnp.float32)
    pos2 = jax.random.uniform(k6, (N2, 1), dtype=jnp.float32)

    out2 = det_loss(dists2, anc2, pos2)
    jax.block_until_ready(out2)
    ref2 = det_loss_ref(dists2, anc2, pos2)
    assert jnp.allclose(out2, ref2, atol=1e-4, rtol=1e-4), (out2, ref2)

    # Test 3: exercise the column-tiled accumulator path + ragged row/col edge
    # tiles (N=160 with tm=64, tn=128 -> 3x2 grid, last tiles padded & masked).
    k7, k8, k9 = jax.random.split(jax.random.PRNGKey(2), 3)
    N3 = 160
    dists3 = jax.random.uniform(k7, (N3, N3), dtype=jnp.float32) * 3.0
    anc3 = jax.random.uniform(k8, (N3, 1), dtype=jnp.float32)
    pos3 = jax.random.uniform(k9, (N3, 1), dtype=jnp.float32)

    out3 = det_loss(dists3, anc3, pos3, tm=64, tn=128)
    jax.block_until_ready(out3)
    ref3 = det_loss_ref(dists3, anc3, pos3)
    assert jnp.allclose(out3, ref3, atol=1e-5, rtol=1e-5), (out3, ref3)

    print("KERNEL_OK")
</pallas_src>

<mosaic_0001>
module attributes {stable_mosaic.version = 11 : i64} {
  func.func @_det_loss_kernel(%arg0: i32, %arg1: i32, %arg2: memref<8x1xi32, #tpu.memory_space<vmem>>, %arg3: memref<8x8xf32, #tpu.memory_space<vmem>>, %arg4: memref<8x1xf32, #tpu.memory_space<vmem>>, %arg5: memref<8x1xf32, #tpu.memory_space<vmem>>, %arg6: memref<8x1xf32, #tpu.memory_space<vmem>>, %arg7: memref<8x1xf32, #tpu.memory_space<vmem>>, %arg8: memref<8x1xf32, #tpu.memory_space<vmem>>) attributes {dimension_semantics = [#tpu.dimension_semantics<parallel>, #tpu.dimension_semantics<arbitrary>], iteration_bounds = array<i64: 1, 1>, scalar_prefetch = 0 : i64, scratch_operands = 2 : i64, tpu.core_type = #tpu.core_type<tc>, window_params = [{transform_indices = @transform_0, window_bounds = array<i64: 8, 1>}, {transform_indices = @transform_1, window_bounds = array<i64: 8, 8>}, {transform_indices = @transform_2, window_bounds = array<i64: 8, 1>}, {transform_indices = @transform_3, window_bounds = array<i64: 8, 1>}, {transform_indices = @transform_4, window_bounds = array<i64: 8, 1>}]} {
    %c0 = arith.constant 0 : index
    %c0_0 = arith.constant 0 : index
    %0 = vector.load %arg3[%c0, %c0_0] : memref<8x8xf32, #tpu.memory_space<vmem>>, vector<8x8xf32>
    %1 = tpu.iota {dimensions = array<i32: 1>} : vector<8x8xi32>
    %c0_1 = arith.constant 0 : index
    %c0_2 = arith.constant 0 : index
    %2 = vector.load %arg2[%c0_1, %c0_2] : memref<8x1xi32, #tpu.memory_space<vmem>>, vector<8x1xi32>
    %3 = vector.broadcast %2 : vector<8x1xi32> to vector<8x8xi32>
    %4 = arith.cmpi eq, %1, %3 : vector<8x8xi32>
    %cst = arith.constant 0.000000e+00 : f32
    %5 = vector.broadcast %cst : f32 to vector<8x8xf32>
    %6 = arith.select %4, %0, %5 : vector<8x8xi1>, vector<8x8xf32>
    %cst_3 = arith.constant dense<0xFF800000> : vector<8xf32>
    %7 = vector.multi_reduction <maximumf>, %6, %cst_3 [1] : vector<8x8xf32> to vector<8xf32>
    %8 = vector.shape_cast %7 : vector<8xf32> to vector<8x1xf32>
    %cst_4 = arith.constant 1.000000e+05 : f32
    %cst_5 = arith.constant 0.000000e+00 : f32
    %9 = vector.broadcast %cst_4 : f32 to vector<8x8xf32>
    %10 = vector.broadcast %cst_5 : f32 to vector<8x8xf32>
    %11 = arith.select %4, %9, %10 : vector<8x8xi1>, vector<8x8xf32>
    %12 = arith.addf %0, %11 : vector<8x8xf32>
    %cst_6 = arith.constant dense<0x7F800000> : vector<8xf32>
    %13 = vector.multi_reduction <minimumf>, %12, %cst_6 [1] : vector<8x8xf32> to vector<8xf32>
    %14 = vector.shape_cast %13 : vector<8xf32> to vector<8x1xf32>
    %c0_7 = arith.constant 0 : index
    %c0_8 = arith.constant 0 : index
    %15 = vector.load %arg4[%c0_7, %c0_8] : memref<8x1xf32, #tpu.memory_space<vmem>>, vector<8x1xf32>
    %c0_9 = arith.constant 0 : index
    %c0_10 = arith.constant 0 : index
    %16 = vector.load %arg5[%c0_9, %c0_10] : memref<8x1xf32, #tpu.memory_space<vmem>>, vector<8x1xf32>
    %17 = arith.addf %15, %16 : vector<8x1xf32>
    %18 = arith.subf %8, %14 : vector<8x1xf32>
    %19 = arith.mulf %18, %17 : vector<8x1xf32>
    %c0_11 = arith.constant 0 : index
    %c0_12 = arith.constant 0 : index
    %20 = vector.load %arg6[%c0_11, %c0_12] : memref<8x1xf32, #tpu.memory_space<vmem>>, vector<8x1xf32>
    tpu.vector_store %arg6[%c0_11, %c0_12], %19 {strides = array<i32>} : memref<8x1xf32, #tpu.memory_space<vmem>>, vector<8x1xf32>,
    return
  }
  func.func @transform_0(%arg0: i32, %arg1: i32) -> (i32, i32) {
    %c0_i32 = arith.constant 0 : i32
    %c0_i32_0 = arith.constant 0 : i32
    return %arg0, %c0_i32 : i32, i32
  }
  func.func @transform_1(%arg0: i32, %arg1: i32) -> (i32, i32) {
    %c0_i32 = arith.constant 0 : i32
    return %arg0, %arg1 : i32, i32
  }
  func.func @transform_2(%arg0: i32, %arg1: i32) -> (i32, i32) {
    %c0_i32 = arith.constant 0 : i32
    %c0_i32_0 = arith.constant 0 : i32
    return %arg0, %c0_i32 : i32, i32
  }
  func.func @transform_3(%arg0: i32, %arg1: i32) -> (i32, i32) {
    %c0_i32 = arith.constant 0 : i32
    %c0_i32_0 = arith.constant 0 : i32
    return %arg0, %c0_i32 : i32, i32
  }
  func.func @transform_4(%arg0: i32, %arg1: i32) -> (i32, i32) {
    %c0_i32 = arith.constant 0 : i32
    %c0_i32_0 = arith.constant 0 : i32
    return %arg0, %c0_i32 : i32, i32
  }
}

</mosaic_0001>

<bundles_post_ra>
// kernel: tpu_custom_call.1
= control target key start
LH: loop header
LB: loop body
LE: loop exit
PB: predicated region body
PF: predicated region fallthrough
CT: control target
= control target key end

     0   :  { %v49_v0 = vmov 0   ;;  %v18_v2 = vlaneseq  ;;  %vm26_vm0 = vcmask 64512   ;;  %v50_v6 = vmov 0.0   ;;  %s91_s0 = inlined_call_operand.vmem [shape: s32[8,1], index: 0, kind: input, shape index: {}]   ;;  %s92_s1 = inlined_call_operand.vmem [shape: f32[8,8], index: 1, kind: input, shape index: {}]   ;;  %s93_s2 = inlined_call_operand.vmem [shape: f32[8,1], index: 2, kind: input, shape index: {}]   ;;  %s94_s3 = inlined_call_operand.vmem [shape: f32[8,1], index: 3, kind: input, shape index: {}]   ;;  %s95_s4 = inlined_call_operand.vmem [shape: f32[8,1], index: 4, kind: output, shape index: {}]  }
   0x1   :  { %48 = vset.pattern.permute.xlu0 %v49_v0  ;;  %v20_v1 = vld [vmem:[%s91_s0] sm:$0xff]  ;;  %vm40_vm2 = vcmask 7168  }
   0x2   :  { %22 = vperm.xlu0 %48, %v20_v1   ;;  %v19_v3 = vand.u32 127, %v18_v2  ;;  %v17_v4 = vld [vmem:[%s92_s1] sm:$0xff] }
   0x3   :  { %v35_v12 = vld [vmem:[%s93_s2] sm:$0xff] }
   0x4   :  { %v36_v13 = vld [vmem:[%s94_s3] sm:$0xff] }
   0x5   :  { %v37_v14 = vadd.f32 %v36_v13, %v35_v12 }
  0x7d   :  { %v23_v5 = vpop.permute.xlu0 %22 }
  0x7e   :  { %vm24_vm1 = vcmp.eq.s32.totalorder %v19_v3, %v23_v5 }
  0x7f   :  { %v30_v7 = vsel %vm24_vm1, 100000.0, %v50_v6  ;;  %v25_v8 = vsel %vm24_vm1, %v17_v4, 0.0 }
  0x80   :  { %v27_v9 = vsel %vm26_vm0, %v25_v8, -inf  ;;  %v31_v10 = vadd.f32 %v30_v7, %v17_v4 }
  0x81   :  { %28 = vmax.xlane.f32.xlu0 %v27_v9 }
  0x82   :  { %v32_v11 = vsel %vm26_vm0, %v31_v10, inf }
  0x83   :  { %33 = vmin.xlane.f32.xlu1 %v32_v11 }
 0x10a   :  { %v29_v15 = vpop.xlane.xlu0 %28 }
 0x10c   :  { %v34_v16 = vpop.xlane.xlu1 %33 }
 0x10d   :  { %v38_v17 = vsub.f32 %v29_v15, %v34_v16 }
 0x10f   :  { %v39_v18 = vmul.f32 %v38_v17, %v37_v14 }
 0x111   :  { %41 = vst.msk [vmem:[%s95_s4] sm:$0xff] %vm40_vm2, %v39_v18 }

</bundles_post_ra>
